<compile_context>
chip_gen: v7x
topology: tpu7x:2x2x1
jax: 0.10.0
libtpu: 0.0.40
codegen_flags: <defaults>
</compile_context>

<pallas_src>
import functools

import jax
import jax.numpy as jnp
from jax import lax
from jax.experimental import pallas as pl
from jax.experimental.pallas import tpu as pltpu

LANES = 128
CHUNK_ROWS = 64                        # rows per inner step (8 f32 vregs/input)
TARGET_BLOCK_BYTES = 4 * 1024 * 1024   # per-input, per-pipeline-buffer block
VMEM_LIMIT_BYTES = 32 * 1024 * 1024


def _sublane_multiple(dtype):
    """Sublane tile for a dtype: 8 (>=32-bit), 16 (16-bit), 32 (8-bit)."""
    return 8 * max(1, 4 // jnp.dtype(dtype).itemsize)


def _pad_value(dtype):
    """Most negative representable logit -> sigmoid(pad) == 0 exactly."""
    dtype = jnp.dtype(dtype)
    if jnp.issubdtype(dtype, jnp.floating):
        return jnp.finfo(dtype).min
    return jnp.iinfo(dtype).min


def _use_core_split():
    """Two TensorCores per chip only on v7x-class parts; 1 on v5e/v6e."""
    try:
        kind = jax.devices()[0].device_kind.lower()
    except Exception:
        return False
    return "v7" in kind


def _make_dice_kernel(*, squared, block_rows, chunk, total_rows, steps,
                      any_masking):
    """Streaming-reduction kernel, specialized on static parameters."""
    n_chunks = block_rows // chunk
    groups = chunk // 8

    def _slab(v):
        # (chunk, 128) -> (8, 128) partial: pure VPU vreg adds (no XLU).
        if groups == 1:
            return v
        return jnp.sum(v.reshape(groups, 8, LANES), axis=0)

    def kernel(x_ref, t_ref, o_ref):
        c = pl.program_id(0)          # core-split index
        j = pl.program_id(1)          # reduction step ("arbitrary")

        @pl.when(j == 0)
        def _():
            o_ref[...] = jnp.zeros(o_ref.shape, o_ref.dtype)

        start = (c * steps + j) * block_rows
        zeros3 = (jnp.zeros((8, LANES), jnp.float32),) * 3

        def step(acc, r0, valid_rows=None):
            acc_i, acc_a, acc_b = acc
            x = x_ref[pl.ds(r0, chunk), :].astype(jnp.float32)
            t = t_ref[pl.ds(r0, chunk), :].astype(jnp.float32)
            # sigmoid(x) == 0.5*tanh(x/2) + 0.5 : one EUP op, no VPU divide.
            s = 0.5 * jnp.tanh(0.5 * x) + 0.5
            if valid_rows is not None:
                # Mask s and t (not the products) so garbage rows of the edge
                # block can never propagate NaN/Inf.
                row = r0 + lax.broadcasted_iota(jnp.int32, (chunk, LANES), 0)
                keep = row < valid_rows
                s = jnp.where(keep, s, 0.0)
                t = jnp.where(keep, t, 0.0)
            inter = s * t
            if squared:
                a, b = s * s, t * t
            else:
                a, b = s, t
            return (acc_i + _slab(inter), acc_a + _slab(a), acc_b + _slab(b))

        def flush(acc):
            o_ref[0:8, :] += acc[0]
            o_ref[8:16, :] += acc[1]
            o_ref[16:24, :] += acc[2]

        def fast_path():
            # Hot path: mask-free, static trip count, 2 chunks per iteration.
            acc = zeros3
            n_pairs = n_chunks // 2
            if n_pairs:
                def body(i, acc):
                    r0 = pl.multiple_of(i * (2 * chunk), 2 * chunk)
                    return step(step(acc, r0), r0 + chunk)
                acc = lax.fori_loop(0, n_pairs, body, acc)
            if n_chunks % 2:
                acc = step(acc, (n_chunks - 1) * chunk)
            flush(acc)

        if not any_masking:
            fast_path()
            return

        valid = jnp.clip(total_rows - start, 0, block_rows)
        is_full = valid == block_rows

        @pl.when(is_full)
        def _():
            fast_path()

        @pl.when(jnp.logical_not(is_full))
        def _():
            # Cold path: at most one partial block per core. Dynamic trip count
            # so a (nearly) empty / clamped-duplicate block costs <= one chunk.
            def body(i, acc):
                r0 = pl.multiple_of(i * chunk, chunk)
                return step(acc, r0, valid_rows=valid)
            n_dyn = (valid + (chunk - 1)) // chunk
            flush(lax.fori_loop(0, n_dyn, body, zeros3))

    return kernel


def _dice_partials(inputs, targets, squared):
    """Per-core partial sums, shape (nsplit, 24, 128) f32.

    Rows  0: 8 -> sum(sigmoid(x) * t)
    Rows  8:16 -> sum(sigmoid(x))   (or sum(sigmoid(x)^2) if squared)
    Rows 16:24 -> sum(t)            (or sum(t^2)          if squared)
    """
    x = inputs.reshape(-1)
    t = targets.reshape(-1)
    if x.dtype == jnp.bool_:
        x = x.astype(jnp.float32)
    if t.dtype == jnp.bool_:
        t = t.astype(jnp.float32)

    mult = max(_sublane_multiple(x.dtype), _sublane_multiple(t.dtype))
    itemsize = max(x.dtype.itemsize, t.dtype.itemsize)

    n = x.shape[0]
    rows = -(-n // LANES)                      # rows of the (rows, 128) view

    if rows < CHUNK_ROWS:
        # Tiny input: pad rows to a sublane multiple -> one unmasked block.
        rows_p = -(-rows // mult) * mult
        block_rows = rows_p
        chunk = rows_p
    else:
        rows_p = rows
        cap = max(CHUNK_ROWS,
                  (TARGET_BLOCK_BYTES // (LANES * itemsize))
                  // CHUNK_ROWS * CHUNK_ROWS)
        block_rows = min(cap, rows // CHUNK_ROWS * CHUNK_ROWS)
        chunk = CHUNK_ROWS

    def pad_to(arr, new_len, fill):
        extra = new_len - arr.shape[0]
        if extra <= 0:
            return arr                        # common case: no copy at all
        return jnp.concatenate([arr, jnp.full((extra,), fill, arr.dtype)])

    total = rows_p * LANES
    # Pad logits with the most negative representable value -> sigmoid == 0
    # exactly; pad targets with 0, so padding contributes nothing to any sum.
    x = pad_to(x, total, _pad_value(x.dtype))
    t = pad_to(t, total, 0)
    x2d = x.reshape(rows_p, LANES)            # free row-major view
    t2d = t.reshape(rows_p, LANES)

    grid_rows = pl.cdiv(rows_p, block_rows)
    nsplit = 2 if (_use_core_split() and grid_rows >= 2) else 1
    steps = pl.cdiv(grid_rows, nsplit)
    any_masking = (nsplit * steps * block_rows) != rows_p

    kernel = _make_dice_kernel(
        squared=squared, block_rows=block_rows, chunk=chunk,
        total_rows=rows_p, steps=steps, any_masking=any_masking)

    def in_map(c, j):
        # Clamp so the core split never addresses a block past the array; any
        # duplicated block contributes zero (its dynamic trip count is 0).
        return (jnp.minimum(c * steps + j, grid_rows - 1), 0)

    lead_sem = pltpu.CORE_PARALLEL if nsplit > 1 else pltpu.ARBITRARY

    cost = pl.CostEstimate(
        flops=6 * total,
        transcendentals=total,
        bytes_accessed=total * (x.dtype.itemsize + t.dtype.itemsize)
        + nsplit * 3 * 8 * LANES * 4,
    )

    return pl.pallas_call(
        kernel,
        out_shape=jax.ShapeDtypeStruct((nsplit, 3 * 8, LANES), jnp.float32),
        grid_spec=pltpu.PrefetchScalarGridSpec(
            num_scalar_prefetch=0,
            grid=(nsplit, steps),
            in_specs=[
                pl.BlockSpec((block_rows, LANES), in_map),
                pl.BlockSpec((block_rows, LANES), in_map),
            ],
            out_specs=pl.BlockSpec((None, 3 * 8, LANES), lambda c, j: (c, 0, 0)),
        ),
        compiler_params=pltpu.CompilerParams(
            dimension_semantics=(lead_sem, pltpu.ARBITRARY),
            vmem_limit_bytes=VMEM_LIMIT_BYTES,
        ),
        cost_estimate=cost,
    )(x2d, t2d)


@functools.partial(jax.jit, static_argnames=("squared",))
def dice_loss(inputs, targets, smooth=1.0, squared=False):
    """JAX/Pallas equivalent of DiceLoss.forward."""
    smooth = jnp.asarray(smooth, jnp.float32)
    if inputs.size == 0:                      # degenerate: every sum is zero
        zero = jnp.float32(0.0)
        return -(2.0 * zero + smooth) / (zero + zero + smooth)
    p = _dice_partials(inputs, targets, bool(squared))
    p = jnp.sum(p, axis=0)                    # fold per-core partial slabs
    inter = jnp.sum(p[0:8])
    a_sum = jnp.sum(p[8:16])                  # sum(s)  or sum(s^2)
    b_sum = jnp.sum(p[16:24])                 # sum(t)  or sum(t^2)
    return -(2.0 * inter + smooth) / (a_sum + b_sum + smooth)


if __name__ == "__main__":
    key = jax.random.PRNGKey(0)
    k1, k2, k3, k4, k5, k6 = jax.random.split(key, 6)

    def ref_loss(x, t, smooth, squared):
        s = jax.nn.sigmoid(x.astype(jnp.float32)).reshape(-1)
        tt = t.astype(jnp.float32).reshape(-1)
        inter = jnp.sum(s * tt)
        if squared:
            denom = jnp.sum(s * s) + jnp.sum(tt * tt) + smooth
        else:
            denom = jnp.sum(s) + jnp.sum(tt) + smooth
        return -(2.0 * inter + smooth) / denom

    # Primary: small NCHW logits / binary targets (tiny single-block path).
    x = jax.random.normal(k1, (2, 4, 16, 16), dtype=jnp.float32)
    t = (jax.random.uniform(k2, (2, 4, 16, 16)) > 0.5).astype(jnp.float32)
    # Secondary: odd-sized tensor exercising lane padding, multi-block grid,
    # the mask-free hot path and the masked dynamic-trip tail block.
    x2 = jax.random.normal(k3, (2, 4, 250, 250), dtype=jnp.float32)
    t2 = (jax.random.uniform(k4, (2, 4, 250, 250)) > 0.5).astype(jnp.float32)
    # Tertiary: bf16 logits streamed in their narrow dtype (cast in-kernel).
    x3 = jax.random.normal(k5, (2, 4, 32, 32), dtype=jnp.bfloat16)
    t3 = (jax.random.uniform(k6, (2, 4, 32, 32)) > 0.5).astype(jnp.float32)

    for xx, tt in ((x, t), (x2, t2), (x3, t3)):
        for squared in (False, True):
            out = jax.block_until_ready(
                dice_loss(xx, tt, smooth=1.0, squared=squared))
            ref = ref_loss(xx, tt, 1.0, squared)
            assert jnp.allclose(out, ref, rtol=1e-4, atol=1e-5), (
                xx.shape, squared, out, ref)

    print("KERNEL_OK")
</pallas_src>

<mosaic_0001>
module attributes {stable_mosaic.version = 11 : i64} {
  func.func @kernel(%arg0: i32, %arg1: i32, %arg2: memref<16x128xf32, #tpu.memory_space<vmem>>, %arg3: memref<16x128xf32, #tpu.memory_space<vmem>>, %arg4: memref<1x24x128xf32, #tpu.memory_space<vmem>>) attributes {dimension_semantics = [#tpu.dimension_semantics<arbitrary>, #tpu.dimension_semantics<arbitrary>], iteration_bounds = array<i64: 1, 1>, scalar_prefetch = 0 : i64, scratch_operands = 0 : i64, tpu.core_type = #tpu.core_type<tc>, window_params = [{transform_indices = @transform_0, window_bounds = array<i64: 16, 128>}, {transform_indices = @transform_1, window_bounds = array<i64: 16, 128>}, {transform_indices = @transform_2, window_bounds = array<i64: 1, 24, 128>}]} {
    %c0_i32 = arith.constant 0 : i32
    %0 = arith.cmpi eq, %arg1, %c0_i32 : i32
    %1 = arith.extui %0 : i1 to i32
    %c0_i32_0 = arith.constant 0 : i32
    %2 = arith.cmpi ne, %1, %c0_i32_0 : i32
    scf.if %2 {
      %cst_26 = arith.constant 0.000000e+00 : f32
      %41 = vector.broadcast %cst_26 : f32 to vector<24x128xf32>
      %c0_27 = arith.constant 0 : index
      %c0_28 = arith.constant 0 : index
      %c0_29 = arith.constant 0 : index
      %42 = vector.load %arg4[%c0_27, %c0_28, %c0_29] : memref<1x24x128xf32, #tpu.memory_space<vmem>>, vector<1x24x128xf32>
      %43 = vector.shape_cast %42 : vector<1x24x128xf32> to vector<24x128xf32>
      %44 = vector.shape_cast %41 : vector<24x128xf32> to vector<1x24x128xf32>
      tpu.vector_store %arg4[%c0_27, %c0_28, %c0_29], %44 {strides = array<i32>} : memref<1x24x128xf32, #tpu.memory_space<vmem>>, vector<1x24x128xf32>,
    } else {
    }
    %cst = arith.constant 0.000000e+00 : f32
    %3 = vector.broadcast %cst : f32 to vector<8x128xf32>
    %c0 = arith.constant 0 : index
    %c0_1 = arith.constant 0 : index
    %4 = vector.load %arg2[%c0, %c0_1] : memref<16x128xf32, #tpu.memory_space<vmem>>, vector<16x128xf32>
    %c0_2 = arith.constant 0 : index
    %c0_3 = arith.constant 0 : index
    %5 = vector.load %arg3[%c0_2, %c0_3] : memref<16x128xf32, #tpu.memory_space<vmem>>, vector<16x128xf32>
    %cst_4 = arith.constant 5.000000e-01 : f32
    %6 = vector.broadcast %cst_4 : f32 to vector<16x128xf32>
    %7 = arith.mulf %6, %4 : vector<16x128xf32>
    %8 = math.tanh %7 : vector<16x128xf32>
    %cst_5 = arith.constant 5.000000e-01 : f32
    %9 = vector.broadcast %cst_5 : f32 to vector<16x128xf32>
    %10 = arith.mulf %9, %8 : vector<16x128xf32>
    %cst_6 = arith.constant 5.000000e-01 : f32
    %11 = vector.broadcast %cst_6 : f32 to vector<16x128xf32>
    %12 = arith.addf %10, %11 : vector<16x128xf32>
    %13 = arith.mulf %12, %5 : vector<16x128xf32>
    %14 = vector.shape_cast %13 : vector<16x128xf32> to vector<2x8x128xf32>
    %cst_7 = arith.constant dense<0.000000e+00> : vector<8x128xf32>
    %15 = vector.multi_reduction <add>, %14, %cst_7 [0] : vector<2x8x128xf32> to vector<8x128xf32>
    %16 = arith.addf %3, %15 : vector<8x128xf32>
    %17 = vector.shape_cast %12 : vector<16x128xf32> to vector<2x8x128xf32>
    %cst_8 = arith.constant dense<0.000000e+00> : vector<8x128xf32>
    %18 = vector.multi_reduction <add>, %17, %cst_8 [0] : vector<2x8x128xf32> to vector<8x128xf32>
    %19 = arith.addf %3, %18 : vector<8x128xf32>
    %20 = vector.shape_cast %5 : vector<16x128xf32> to vector<2x8x128xf32>
    %cst_9 = arith.constant dense<0.000000e+00> : vector<8x128xf32>
    %21 = vector.multi_reduction <add>, %20, %cst_9 [0] : vector<2x8x128xf32> to vector<8x128xf32>
    %22 = arith.addf %3, %21 : vector<8x128xf32>
    %c0_10 = arith.constant 0 : index
    %c0_11 = arith.constant 0 : index
    %c0_12 = arith.constant 0 : index
    %23 = vector.load %arg4[%c0_10, %c0_11, %c0_12] : memref<1x24x128xf32, #tpu.memory_space<vmem>>, vector<1x8x128xf32>
    %24 = vector.shape_cast %23 : vector<1x8x128xf32> to vector<8x128xf32>
    %25 = arith.addf %24, %16 : vector<8x128xf32>
    %c0_13 = arith.constant 0 : index
    %c0_14 = arith.constant 0 : index
    %c0_15 = arith.constant 0 : index
    %26 = vector.load %arg4[%c0_13, %c0_14, %c0_15] : memref<1x24x128xf32, #tpu.memory_space<vmem>>, vector<1x8x128xf32>
    %27 = vector.shape_cast %26 : vector<1x8x128xf32> to vector<8x128xf32>
    %28 = vector.shape_cast %25 : vector<8x128xf32> to vector<1x8x128xf32>
    tpu.vector_store %arg4[%c0_13, %c0_14, %c0_15], %28 {strides = array<i32>} : memref<1x24x128xf32, #tpu.memory_space<vmem>>, vector<1x8x128xf32>,
    %c0_16 = arith.constant 0 : index
    %c8 = arith.constant 8 : index
    %c0_17 = arith.constant 0 : index
    %29 = vector.load %arg4[%c0_16, %c8, %c0_17] : memref<1x24x128xf32, #tpu.memory_space<vmem>>, vector<1x8x128xf32>
    %30 = vector.shape_cast %29 : vector<1x8x128xf32> to vector<8x128xf32>
    %31 = arith.addf %30, %19 : vector<8x128xf32>
    %c0_18 = arith.constant 0 : index
    %c8_19 = arith.constant 8 : index
    %c0_20 = arith.constant 0 : index
    %32 = vector.load %arg4[%c0_18, %c8_19, %c0_20] : memref<1x24x128xf32, #tpu.memory_space<vmem>>, vector<1x8x128xf32>
    %33 = vector.shape_cast %32 : vector<1x8x128xf32> to vector<8x128xf32>
    %34 = vector.shape_cast %31 : vector<8x128xf32> to vector<1x8x128xf32>
    tpu.vector_store %arg4[%c0_18, %c8_19, %c0_20], %34 {strides = array<i32>} : memref<1x24x128xf32, #tpu.memory_space<vmem>>, vector<1x8x128xf32>,
    %c0_21 = arith.constant 0 : index
    %c16 = arith.constant 16 : index
    %c0_22 = arith.constant 0 : index
    %35 = vector.load %arg4[%c0_21, %c16, %c0_22] : memref<1x24x128xf32, #tpu.memory_space<vmem>>, vector<1x8x128xf32>
    %36 = vector.shape_cast %35 : vector<1x8x128xf32> to vector<8x128xf32>
    %37 = arith.addf %36, %22 : vector<8x128xf32>
    %c0_23 = arith.constant 0 : index
    %c16_24 = arith.constant 16 : index
    %c0_25 = arith.constant 0 : index
    %38 = vector.load %arg4[%c0_23, %c16_24, %c0_25] : memref<1x24x128xf32, #tpu.memory_space<vmem>>, vector<1x8x128xf32>
    %39 = vector.shape_cast %38 : vector<1x8x128xf32> to vector<8x128xf32>
    %40 = vector.shape_cast %37 : vector<8x128xf32> to vector<1x8x128xf32>
    tpu.vector_store %arg4[%c0_23, %c16_24, %c0_25], %40 {strides = array<i32>} : memref<1x24x128xf32, #tpu.memory_space<vmem>>, vector<1x8x128xf32>,
    return
  }
  func.func @transform_0(%arg0: i32, %arg1: i32) -> (i32, i32) {
    %c1_i32 = arith.constant 1 : i32
    %0 = arith.muli %arg0, %c1_i32 : i32
    %1 = arith.addi %0, %arg1 : i32
    %c0_i32 = arith.constant 0 : i32
    %2 = arith.minsi %1, %c0_i32 : i32
    %c0_i32_0 = arith.constant 0 : i32
    %c0_i32_1 = arith.constant 0 : i32
    return %2, %c0_i32_0 : i32, i32
  }
  func.func @transform_1(%arg0: i32, %arg1: i32) -> (i32, i32) {
    %c1_i32 = arith.constant 1 : i32
    %0 = arith.muli %arg0, %c1_i32 : i32
    %1 = arith.addi %0, %arg1 : i32
    %c0_i32 = arith.constant 0 : i32
    %2 = arith.minsi %1, %c0_i32 : i32
    %c0_i32_0 = arith.constant 0 : i32
    %c0_i32_1 = arith.constant 0 : i32
    return %2, %c0_i32_0 : i32, i32
  }
  func.func @transform_2(%arg0: i32, %arg1: i32) -> (i32, i32, i32) {
    %c0_i32 = arith.constant 0 : i32
    %c0_i32_0 = arith.constant 0 : i32
    %c0_i32_1 = arith.constant 0 : i32
    return %arg0, %c0_i32, %c0_i32_0 : i32, i32, i32
  }
}

</mosaic_0001>

<bundles_post_ra>
// kernel: dice_loss.1
= control target key start
LH: loop header
LB: loop body
LE: loop exit
PB: predicated region body
PF: predicated region fallthrough
CT: control target
= control target key end

     0   :  { %s168_s0 = inlined_call_operand.vmem [shape: f32[16,128], index: 0, kind: input, shape index: {}]   ;;  %s169_s1 = inlined_call_operand.vmem [shape: f32[16,128], index: 1, kind: input, shape index: {}]   ;;  %s170_s2 = inlined_call_operand.vmem [shape: f32[1,24,128], index: 2, kind: output, shape index: {}]  }
   0x1   :  { %v82_v0 = vld [vmem:[%s168_s0] sm:$0xff]  ;;  %v83_v1 = vld [vmem:[%s168_s0 + $0x8] sm:$0xff] }
   0x2   :  { %v84_v2 = vld [vmem:[%s169_s1] sm:$0xff]  ;;  %v85_v3 = vld [vmem:[%s169_s1 + $0x8] sm:$0xff]  ;;  %v86_v4 = vmul.f32 0.5, %v82_v0  ;;  %v87_v5 = vmul.f32 0.5, %v83_v1 }
   0x3   :  { %v100_v6 = vadd.f32 %v85_v3, %v84_v2 }
   0x4   :  { %128 = vtanh.f32 %v86_v4 }
   0x5   :  { %130 = vtanh.f32 %v87_v5  ;;  %110 = vst [vmem:[%s170_s2 + $0x10] sm:$0xff] %v100_v6 }
   0xe   :  { %v129_v7 = vpop.eup %128 }
   0xf   :  { %v131_v8 = vpop.eup %130  ;;  %v90_v9 = vmul.f32 0.5, %v129_v7 }
  0x10   :  { %v91_v10 = vmul.f32 0.5, %v131_v8 }
  0x11   :  { %v92_v11 = vadd.f32 0.5, %v90_v9 }
  0x12   :  { %v93_v12 = vadd.f32 0.5, %v91_v10 }
  0x13   :  { %v94_v13 = vmul.f32 %v92_v11, %v84_v2 }
  0x14   :  { %v95_v14 = vmul.f32 %v93_v12, %v85_v3  ;;  %v98_v15 = vadd.f32 %v93_v12, %v92_v11 }
  0x16   :  { %v96_v16 = vadd.f32 %v95_v14, %v94_v13  ;;  %107 = vst [vmem:[%s170_s2 + $0x8] sm:$0xff] %v98_v15 }
  0x18   :  { %104 = vst [vmem:[%s170_s2] sm:$0xff] %v96_v16 }

</bundles_post_ra>
